<compile_context>
chip_gen: v5e
topology: v5e:2x2
jax: 0.10.0
libtpu: 0.0.40
codegen_flags: <defaults>
</compile_context>

<pallas_src>
import jax
import jax.numpy as jnp
from jax.experimental import pallas as pl
from jax.experimental.pallas import tpu as pltpu


def _round_up(n, m):
    return ((n + m - 1) // m) * m


def _qvalue_kernel(x_ref, w_ref, b_ref, out_ref):
    # x_ref : (TILE_B, P) bf16   -- padded input rows
    # w_ref : (3, P, P)  bf16    -- [W1; W2; W3], zero-padded, (in, out) layout
    # b_ref : (3, P)     f32     -- [b1; b2; b3], zero-padded
    # out_ref: (TILE_B, P) f32   -- lane-dense; only first action_space lanes meaningful
    x = x_ref[...]                              # (TB, P) bf16
    w1 = w_ref[0]                               # (P, P) bf16
    w2 = w_ref[1]
    w3 = w_ref[2]
    b1 = b_ref[0:1, :]                          # (1, P) f32
    b2 = b_ref[1:2, :]
    b3 = b_ref[2:3, :]

    # fc1 + tanh  (bf16 MXU inputs, f32 accumulate / bias / tanh)
    h1 = jnp.tanh(jnp.dot(x, w1, preferred_element_type=jnp.float32) + b1)
    # fc2 + tanh
    h2 = jnp.tanh(
        jnp.dot(h1.astype(jnp.bfloat16), w2, preferred_element_type=jnp.float32) + b2
    )
    # fc3 (no activation) -- full 128-lane store (lane-dense)
    out_ref[...] = (
        jnp.dot(h2.astype(jnp.bfloat16), w3, preferred_element_type=jnp.float32) + b3
    )


def pack_params(params):
    """Pack (w1,b1,w2,b2,w3,b3) [f32, (in,out) layout] into
    (w_slab (3,P,P) bf16, b_pack (3,P) f32) with P = lane-aligned max dim.
    Zero padding keeps the math exact (padded hidden lanes stay 0 through tanh)."""
    w1, b1, w2, b2, w3, b3 = params
    dims = [w1.shape[0], w1.shape[1], w2.shape[1], w3.shape[1]]
    P = _round_up(max(dims), 128)

    def pad_w(w):
        return jnp.zeros((P, P), jnp.float32).at[: w.shape[0], : w.shape[1]].set(w)

    def pad_b(b):
        return jnp.zeros((P,), jnp.float32).at[: b.shape[-1]].set(b.reshape(-1))

    w_slab = jnp.stack([pad_w(w1), pad_w(w2), pad_w(w3)]).astype(jnp.bfloat16)
    b_pack = jnp.stack([pad_b(b1), pad_b(b2), pad_b(b3)])  # f32
    return w_slab, b_pack


def q_value_forward(x, packed_params, action_space, tile_b=512):
    """Runs the Q_Value forward pass. Returns (mu, std) like the PyTorch module."""
    w_slab, b_pack = packed_params
    P = w_slab.shape[-1]
    B, S = x.shape

    # Batch tile: multiple of 8 sublanes, capped by (rounded-up) batch.
    tb = _round_up(min(tile_b, _round_up(B, 8)), 8)
    Bp = _round_up(B, tb)

    # Pad batch + lanes once and cast to bf16 for the MXU (single fused XLA op).
    xp = jnp.zeros((Bp, P), w_slab.dtype).at[:B, :S].set(x.astype(w_slab.dtype))

    out = pl.pallas_call(
        _qvalue_kernel,
        out_shape=jax.ShapeDtypeStruct((Bp, P), jnp.float32),
        grid_spec=pltpu.PrefetchScalarGridSpec(
            num_scalar_prefetch=0,
            grid=(Bp // tb,),
            in_specs=[
                pl.BlockSpec((tb, P), lambda i: (i, 0)),        # x: streamed over batch
                pl.BlockSpec((3, P, P), lambda i: (0, 0, 0)),   # weights: VMEM-resident
                pl.BlockSpec((3, P), lambda i: (0, 0)),         # biases:  VMEM-resident
            ],
            out_specs=pl.BlockSpec((tb, P), lambda i: (i, 0)),  # lane-dense output
        ),
        compiler_params=pltpu.CompilerParams(
            dimension_semantics=("parallel",),                  # megacore / v7x 2 TCs
        ),
    )(xp, w_slab, b_pack)

    fc3_out = out[:B, :action_space]
    mu = fc3_out[:, :action_space]           # whole fc3 output (as in the reference)
    logstd = fc3_out[:, action_space:]       # EMPTY (B, 0) slice, same as PyTorch ref
    std = jnp.exp(logstd)
    return mu, std


def init_params(key, state_size, hidden_size, action_space):
    """Deterministic synthetic init matching the PyTorch module's shapes.

    nn.Linear uses U(-1/sqrt(fan_in), 1/sqrt(fan_in)); then fc3.weight *= 0.1,
    fc3.bias *= 0.0.  Weights stored as (in, out) = transpose of PyTorch (out, in)."""
    k1, k2, k3, k4, k5, k6 = jax.random.split(key, 6)

    def uniform(k, shape, fan_in):
        bound = 1.0 / jnp.sqrt(jnp.float32(fan_in))
        return jax.random.uniform(k, shape, jnp.float32, -bound, bound)

    w1 = uniform(k1, (state_size, hidden_size), state_size)
    b1 = uniform(k2, (1, hidden_size), state_size)
    w2 = uniform(k3, (hidden_size, hidden_size), hidden_size)
    b2 = uniform(k4, (1, hidden_size), hidden_size)
    w3 = uniform(k5, (hidden_size, action_space), hidden_size) * 0.1
    b3 = uniform(k6, (1, action_space), hidden_size) * 0.0
    return (w1, b1, w2, b2, w3, b3)


if __name__ == "__main__":
    batch = 8
    state_size = 16
    hidden_size = 32
    action_space = 4

    key = jax.random.PRNGKey(0)
    k_x, k_p = jax.random.split(key)
    x = jax.random.normal(k_x, (batch, state_size), dtype=jnp.float32)
    params = init_params(k_p, state_size, hidden_size, action_space)
    packed = pack_params(params)

    mu, std = q_value_forward(x, packed, action_space)
    jax.block_until_ready(mu)
    jax.block_until_ready(std)

    assert mu.shape == (batch, action_space)
    assert std.shape == (batch, 0)  # matches PyTorch: x[:, action_space:] is empty

    # Reference 1: same bf16-input / f32-accumulate arithmetic as the kernel.
    w1, b1, w2, b2, w3, b3 = params
    bf = jnp.bfloat16
    h = jnp.tanh(jnp.dot(x.astype(bf), w1.astype(bf),
                         preferred_element_type=jnp.float32) + b1)
    h = jnp.tanh(jnp.dot(h.astype(bf), w2.astype(bf),
                         preferred_element_type=jnp.float32) + b2)
    ref_bf16 = jnp.dot(h.astype(bf), w3.astype(bf),
                       preferred_element_type=jnp.float32) + b3
    assert jnp.allclose(mu, ref_bf16, atol=1e-4, rtol=1e-3)

    # Reference 2: pure f32 module math (loose tolerance covers bf16 MXU inputs).
    h32 = jnp.tanh(x @ w1 + b1)
    h32 = jnp.tanh(h32 @ w2 + b2)
    ref_f32 = h32 @ w3 + b3
    assert jnp.allclose(mu, ref_f32, atol=1e-2, rtol=5e-2)

    print("KERNEL_OK")
</pallas_src>

<mosaic_0001>
module attributes {stable_mosaic.version = 11 : i64} {
  func.func @_qvalue_kernel(%arg0: i32, %arg1: memref<8x128xbf16, #tpu.memory_space<vmem>>, %arg2: memref<3x128x128xbf16, #tpu.memory_space<vmem>>, %arg3: memref<3x128xf32, #tpu.memory_space<vmem>>, %arg4: memref<8x128xf32, #tpu.memory_space<vmem>>) attributes {dimension_semantics = [#tpu.dimension_semantics<parallel>], iteration_bounds = array<i64: 1>, scalar_prefetch = 0 : i64, scratch_operands = 0 : i64, tpu.core_type = #tpu.core_type<tc>, window_params = [{transform_indices = @transform_0, window_bounds = array<i64: 8, 128>}, {pipeline_mode = #tpu.pipeline_mode<synchronous>, transform_indices = @transform_1, window_bounds = array<i64: 3, 128, 128>}, {pipeline_mode = #tpu.pipeline_mode<synchronous>, transform_indices = @transform_2, window_bounds = array<i64: 3, 128>}, {transform_indices = @transform_3, window_bounds = array<i64: 8, 128>}]} {
    %c0 = arith.constant 0 : index
    %c0_0 = arith.constant 0 : index
    %0 = vector.load %arg1[%c0, %c0_0] : memref<8x128xbf16, #tpu.memory_space<vmem>>, vector<8x128xbf16>
    %c0_1 = arith.constant 0 : index
    %c0_2 = arith.constant 0 : index
    %c0_3 = arith.constant 0 : index
    %1 = vector.load %arg2[%c0_1, %c0_2, %c0_3] : memref<3x128x128xbf16, #tpu.memory_space<vmem>>, vector<1x128x128xbf16>
    %2 = vector.shape_cast %1 : vector<1x128x128xbf16> to vector<128x128xbf16>
    %c1 = arith.constant 1 : index
    %c0_4 = arith.constant 0 : index
    %c0_5 = arith.constant 0 : index
    %3 = vector.load %arg2[%c1, %c0_4, %c0_5] : memref<3x128x128xbf16, #tpu.memory_space<vmem>>, vector<1x128x128xbf16>
    %4 = vector.shape_cast %3 : vector<1x128x128xbf16> to vector<128x128xbf16>
    %c2 = arith.constant 2 : index
    %c0_6 = arith.constant 0 : index
    %c0_7 = arith.constant 0 : index
    %5 = vector.load %arg2[%c2, %c0_6, %c0_7] : memref<3x128x128xbf16, #tpu.memory_space<vmem>>, vector<1x128x128xbf16>
    %6 = vector.shape_cast %5 : vector<1x128x128xbf16> to vector<128x128xbf16>
    %c0_8 = arith.constant 0 : index
    %c0_9 = arith.constant 0 : index
    %7 = vector.load %arg3[%c0_8, %c0_9] : memref<3x128xf32, #tpu.memory_space<vmem>>, vector<1x128xf32>
    %c1_10 = arith.constant 1 : index
    %c0_11 = arith.constant 0 : index
    %8 = vector.load %arg3[%c1_10, %c0_11] : memref<3x128xf32, #tpu.memory_space<vmem>>, vector<1x128xf32>
    %c2_12 = arith.constant 2 : index
    %c0_13 = arith.constant 0 : index
    %9 = vector.load %arg3[%c2_12, %c0_13] : memref<3x128xf32, #tpu.memory_space<vmem>>, vector<1x128xf32>
    %cst = arith.constant dense<0.000000e+00> : vector<8x128xf32>
    %10 = tpu.matmul %0, %2, %cst {dimension_numbers = #tpu.dot_dimension_numbers<[1], [0], [0], [1], [0, 0, 1, 1], [], []>} : vector<8x128xbf16>, vector<128x128xbf16>, vector<8x128xf32> -> vector<8x128xf32>
    %11 = vector.broadcast %7 : vector<1x128xf32> to vector<8x128xf32>
    %12 = arith.addf %10, %11 : vector<8x128xf32>
    %13 = math.tanh %12 : vector<8x128xf32>
    %14 = arith.truncf %13 : vector<8x128xf32> to vector<8x128xbf16>
    %cst_14 = arith.constant dense<0.000000e+00> : vector<8x128xf32>
    %15 = tpu.matmul %14, %4, %cst_14 {dimension_numbers = #tpu.dot_dimension_numbers<[1], [0], [0], [1], [0, 0, 1, 1], [], []>} : vector<8x128xbf16>, vector<128x128xbf16>, vector<8x128xf32> -> vector<8x128xf32>
    %16 = vector.broadcast %8 : vector<1x128xf32> to vector<8x128xf32>
    %17 = arith.addf %15, %16 : vector<8x128xf32>
    %18 = math.tanh %17 : vector<8x128xf32>
    %19 = arith.truncf %18 : vector<8x128xf32> to vector<8x128xbf16>
    %cst_15 = arith.constant dense<0.000000e+00> : vector<8x128xf32>
    %20 = tpu.matmul %19, %6, %cst_15 {dimension_numbers = #tpu.dot_dimension_numbers<[1], [0], [0], [1], [0, 0, 1, 1], [], []>} : vector<8x128xbf16>, vector<128x128xbf16>, vector<8x128xf32> -> vector<8x128xf32>
    %21 = vector.broadcast %9 : vector<1x128xf32> to vector<8x128xf32>
    %22 = arith.addf %20, %21 : vector<8x128xf32>
    %c0_16 = arith.constant 0 : index
    %c0_17 = arith.constant 0 : index
    %23 = vector.load %arg4[%c0_16, %c0_17] : memref<8x128xf32, #tpu.memory_space<vmem>>, vector<8x128xf32>
    tpu.vector_store %arg4[%c0_16, %c0_17], %22 {strides = array<i32>} : memref<8x128xf32, #tpu.memory_space<vmem>>, vector<8x128xf32>,
    return
  }
  func.func @transform_0(%arg0: i32) -> (i32, i32) {
    %c0_i32 = arith.constant 0 : i32
    %c0_i32_0 = arith.constant 0 : i32
    return %arg0, %c0_i32 : i32, i32
  }
  func.func @transform_1(%arg0: i32) -> (i32, i32, i32) {
    %c0_i32 = arith.constant 0 : i32
    %c0_i32_0 = arith.constant 0 : i32
    %c0_i32_1 = arith.constant 0 : i32
    %c0_i32_2 = arith.constant 0 : i32
    return %c0_i32, %c0_i32_0, %c0_i32_1 : i32, i32, i32
  }
  func.func @transform_2(%arg0: i32) -> (i32, i32) {
    %c0_i32 = arith.constant 0 : i32
    %c0_i32_0 = arith.constant 0 : i32
    %c0_i32_1 = arith.constant 0 : i32
    return %c0_i32, %c0_i32_0 : i32, i32
  }
  func.func @transform_3(%arg0: i32) -> (i32, i32) {
    %c0_i32 = arith.constant 0 : i32
    %c0_i32_0 = arith.constant 0 : i32
    return %arg0, %c0_i32 : i32, i32
  }
}

</mosaic_0001>

<bundles_post_ra>
// kernel: tpu_custom_call.1
= control target key start
LH: loop header
LB: loop body
LE: loop exit
PB: predicated region body
PF: predicated region fallthrough
CT: control target
= control target key end

     0   :  { %8 = vsyncpa [#allocation3], 0  ;;  %s594_s0 = inlined_call_operand.hbm [shape: bf16[8,128], index: 0, kind: input, shape index: {}]   ;;  %s595_s1 = inlined_call_operand.hbm [shape: bf16[3,128,128], index: 1, kind: input, shape index: {}]   ;;  %s596_s2 = inlined_call_operand.hbm [shape: f32[3,128], index: 2, kind: input, shape index: {}]   ;;  %s597_s3 = inlined_call_operand.hbm [shape: f32[8,128], index: 3, kind: output, shape index: {}]  }
   0x1   :  { %9 = vsyncpa [#allocation6], 0  ;;  %s26_s14 = sshll.u32 %s595_s1, 4  ;;  %s27_s14 = int_to_ptr.hbm [resolvable:$true] %s26_s14 }
   0x2   :  { %10 = vsyncpa [#allocation4], 0  ;;  %s556_s15 = smov [#allocation5]   ;;  %s16_s19 = sshll.u32 %s594_s0, 4  ;;  %s17_s19 = int_to_ptr.hbm [resolvable:$true] %s16_s19 }
   0x3   :  { %s28_s16 = sshll.u32 %s556_s15, 4  ;;  %s557_s20 = smov 64   ;;  %s29_s16 = int_to_ptr.vmem [resolvable:$true] %s28_s16 }
   0x4   :  { %s558_s21 = smov 4   ;;  %s559_s22 = smov [#allocation2]  }
   0x5   :  { %34 = dma.hbm_to_vmem [thread:$0]  %s27_s14, 3072, %s29_s16, [#allocation6], %s557_s20, %s557_s20, %s558_s21  }
   0x6   :  { %s18_s23 = sshll.u32 %s559_s22, 4  ;;  %s40_s26 = sshll.u32 %s596_s2, 4  ;;  %s19_s23 = int_to_ptr.vmem [resolvable:$true] %s18_s23  ;;  %s41_s26 = int_to_ptr.hbm [resolvable:$true] %s40_s26 }
   0x7   :  { %21 = dma.hbm_to_vmem [thread:$0]  %s17_s19, 64, %s19_s23, [#allocation3]  }
   0x8   :  { %s560_s1 = smov [#allocation7]  }
   0x9   :  { %s42_s27 = sshll.u32 %s560_s1, 4  ;;  %s43_s27 = int_to_ptr.vmem [resolvable:$true] %s42_s27 }
   0xa   :  { %45 = dma.hbm_to_vmem [thread:$0]  %s41_s26, 64, %s43_s27, [#allocation6]  }
   0xb   :  { %550 = dma.done.wait [#allocation3], 64  }
   0xc   :  { %551 = vsyncadd [#allocation3], 4294967232 }
   0xd   :  { %552 = dma.done.wait [#allocation6], 3136  }
   0xe   :  { %553 = vsyncadd [#allocation6], 4294964160  ;;  %v424_v0 = vld [vmem:[#allocation5 + $0x38] sm:$0xff]  ;;  %v423_v1 = vld [vmem:[#allocation5 + $0x30] sm:$0xff]  ;;  %s561_s0 = smov [#allocation8]   ;;  %s310_s30 = sshll.u32 %s597_s3, 4  ;;  %s311_s30 = int_to_ptr.hbm [resolvable:$true] %s310_s30 }
   0xf   :  { %161 = vmatpush.bf16.msra.mxu0 %v424_v0  ;;  %v432_v2 = vld [vmem:[#allocation5 + $0x78] sm:$0xff]  ;;  %v431_v3 = vld [vmem:[#allocation5 + $0x70] sm:$0xff]  ;;  %v422_v4 = vld [vmem:[#allocation5 + $0x28] sm:$0xff]  ;;  %s308_s2 = sshll.u32 %s561_s0, 4  ;;  %s309_s2 = int_to_ptr.vmem [resolvable:$true] %s308_s2 }
  0x10   :  { %225 = vmatpush.bf16.msra.mxu1 %v432_v2  ;;  %v430_v5 = vld [vmem:[#allocation5 + $0x68] sm:$0xff]  ;;  %v421_v6 = vld [vmem:[#allocation5 + $0x20] sm:$0xff]  ;;  %v420_v8 = vld [vmem:[#allocation5 + $0x18] sm:$0xff] }
  0x11   :  { %v429_v7 = vld [vmem:[#allocation5 + $0x60] sm:$0xff]  ;;  %v428_v9 = vld [vmem:[#allocation5 + $0x58] sm:$0xff]  ;;  %v419_v10 = vld [vmem:[#allocation5 + $0x10] sm:$0xff] }
  0x12   :  { %v418_v11 = vld [vmem:[#allocation5 + $0x8] sm:$0xff]  ;;  %v417_v12 = vld [vmem:[#allocation5] sm:$0xff]  ;;  %v58_v13 = vld [vmem:[#allocation2] sm:$0xf] }
  0x13   :  { %162 = vmatpush.bf16.msra.mxu0 %v423_v1  ;;  %v427_v14 = vld [vmem:[#allocation5 + $0x50] sm:$0xff]  ;;  %v426_v15 = vld [vmem:[#allocation5 + $0x48] sm:$0xff]  ;;  %v425_v16 = vld [vmem:[#allocation5 + $0x40] sm:$0xff] }
  0x14   :  { %226 = vmatpush.bf16.msra.mxu1 %v431_v3  ;;  %v440_v17 = vld [vmem:[#allocation5 + $0xb8] sm:$0xff]  ;;  %v439_v18 = vld [vmem:[#allocation5 + $0xb0] sm:$0xff]  ;;  %v438_v19 = vld [vmem:[#allocation5 + $0xa8] sm:$0xff] }
  0x15   :  { %289 = vmatpush.bf16.msra.mxu2 %v440_v17  ;;  %v437_v20 = vld [vmem:[#allocation5 + $0xa0] sm:$0xff]  ;;  %v436_v21 = vld [vmem:[#allocation5 + $0x98] sm:$0xff]  ;;  %v435_v28 = vld [vmem:[#allocation5 + $0x90] sm:$0xff] }
  0x16   :  { %v447_v22 = vld [vmem:[#allocation7] ss:$0 sm:$0xff]  ;;  %v434_v29 = vld [vmem:[#allocation5 + $0x88] sm:$0xff]  ;;  %v448_v31 = vld [vmem:[#allocation7 + $0x1] ss:$0 sm:$0xff] }
  0x17   :  { %163 = vmatpush.bf16.msra.mxu0 %v422_v4  ;;  %v433_v30 = vld [vmem:[#allocation5 + $0x80] sm:$0xff] }
  0x18   :  { %227 = vmatpush.bf16.msra.mxu1 %v430_v5  ;;  %v449_v37 = vld [vmem:[#allocation7 + $0x2] ss:$0 sm:$0xff] }
  0x19   :  { %290 = vmatpush.bf16.msra.mxu2 %v439_v18 }
  0x1b   :  { %164 = vmatpush.bf16.msra.mxu0 %v421_v6 }
  0x1c   :  { %228 = vmatpush.bf16.msra.mxu1 %v429_v7 }
  0x1d   :  { %291 = vmatpush.bf16.msra.mxu2 %v438_v19 }
  0x1f   :  { %165 = vmatpush.bf16.msra.mxu0 %v420_v8 }
  0x20   :  { %229 = vmatpush.bf16.msra.mxu1 %v428_v9 }
  0x21   :  { %292 = vmatpush.bf16.msra.mxu2 %v437_v20 }
  0x23   :  { %166 = vmatpush.bf16.msra.mxu0 %v419_v10 }
  0x24   :  { %230 = vmatpush.bf16.msra.mxu1 %v427_v14 }
  0x25   :  { %293 = vmatpush.bf16.msra.mxu2 %v436_v21 }
  0x27   :  { %167 = vmatpush.bf16.msra.mxu0 %v418_v11 }
  0x28   :  { %231 = vmatpush.bf16.msra.mxu1 %v426_v15 }
  0x29   :  { %294 = vmatpush.bf16.msra.mxu2 %v435_v28 }
  0x2b   :  { %168 = vmatpush.bf16.msra.mxu0 %v417_v12 }
  0x2c   :  { %232 = vmatpush.bf16.msra.mxu1 %v425_v16 }
  0x2d   :  { %295 = vmatpush.bf16.msra.mxu2 %v434_v29 }
  0x2e   :  { %169 = vmatmul.bf16.vlgmr.msra.gmra.mxu0 %v58_v13 }
  0x31   :  { %296 = vmatpush.bf16.msra.mxu2 %v433_v30 }
  0xab   :  { %v170_v23 = vpop.f32.mrf.mxu0 }
  0xac   :  { %v171_v24 = vadd.f32 %v447_v22, %v170_v23 }
  0xae   :  { %450 = vtanh.f32 %v171_v24 }
  0xb3   :  { %v172_v25 = vpop.f32.mrf.mxu0 }
  0xb4   :  { %v451_v26 = vpop.eup %450 }
  0xb5   :  { %v175_v27 = vpack.c.bf16 %v451_v26, %v451_v26 }
  0xb7   :  { %233 = vmatmul.bf16.vlgmr.msra.gmra.mxu1 %v175_v27 }
 0x134   :  { %v234_v32 = vpop.f32.mrf.mxu1 }
 0x135   :  { %v235_v33 = vadd.f32 %v448_v31, %v234_v32 }
 0x137   :  { %452 = vtanh.f32 %v235_v33 }
 0x13c   :  { %v236_v34 = vpop.f32.mrf.mxu1 }
 0x13d   :  { %v453_v35 = vpop.eup %452 }
 0x13e   :  { %v239_v36 = vpack.c.bf16 %v453_v35, %v453_v35 }
 0x140   :  { %297 = vmatmul.bf16.vlgmr.msra.gmra.mxu2 %v239_v36 }
 0x1c3   :  { %v298_v38 = vpop.f32.mrf.mxu2 }
 0x1c4   :  { %v299_v39 = vadd.f32 %v449_v37, %v298_v38 }
 0x1c6   :  { %302 = vst [vmem:[#allocation8] sm:$0xff] %v299_v39 }
 0x1c7   :  { %313 = dma.vmem_to_hbm [thread:$0]  %s309_s2, 128, %s311_s30, [#allocation4]  }
 0x1cb   :  { %v300_v40 = vpop.f32.mrf.mxu2 }
 0x1cc   :  { %554 = dma.done.wait [#allocation4], 128  }
 0x1cd   :  { %555 = vsyncadd [#allocation4], 4294967168 }
 0x1ce   :  { %318 = vsyncpa [#allocation3], 1 }
 0x1cf   :  { %319 = vsyncpa [#allocation6], 1 }
 0x1d0   :  { %320 = vsyncpa [#allocation4], 1 }

</bundles_post_ra>
